<compile_context>
chip_gen: v7x
topology: tpu7x:2x2x1
jax: 0.10.0
libtpu: 0.0.40
codegen_flags: <defaults>
</compile_context>

<pallas_src>
import math
from functools import partial

import jax
import jax.numpy as jnp
from jax.experimental import pallas as pl
from jax.experimental.pallas import tpu as pltpu


def cve_kernel(x_ref, w1_ref, b1_ref, w2_ref, o_ref, *, group, int_dim, chunks,
               lane_w):
    # x_ref : (trx, 128)              f32   lane-dense scalars
    # w1_ref: (1, int_dim*group)      f32   W1[0, j] repeated `group` times (k = j*group + g)
    # b1_ref: (1, int_dim*group)      f32   b1[j] repeated `group` times
    # w2_ref: (int_dim*group, lane_w) bf16  block-diagonal packed W2
    # o_ref : (trx, chunks*lane_w)    f32
    w1t = w1_ref[...]
    b1t = b1_ref[...]
    w2p = w2_ref[...]
    for c in range(chunks):                       # static unroll, chunks = 128 // group
        xs = x_ref[:, pl.ds(c * group, group)]    # (trx, group) f32
        # Lane-tile the group int_dim times -> K ordered [j, g]; first layer on VPU/EUP.
        xb = jnp.concatenate([xs] * int_dim, axis=1)          # (trx, int_dim*group) f32
        h = jnp.tanh(xb * w1t + b1t).astype(jnp.bfloat16)     # keep x*W1+b1 in f32
        # Single-pass bf16 MXU matmul, f32 accumulate.
        y = jnp.dot(h, w2p, preferred_element_type=jnp.float32)   # (trx, lane_w)
        o_ref[:, pl.ds(c * lane_w, lane_w)] = y.astype(o_ref.dtype)


def cve_forward(x, w1, b1, w2, *, block_rows=512):
    """x: (B, S) float -> (B, S, hid_dim) float32.

    block_rows = number of 128-scalar x rows per grid step (512 -> 8 MiB output
    block, ~17 MiB double-buffered footprint).
    """
    B, S = x.shape
    int_dim, hid_dim = w2.shape
    N = B * S

    # G scalars share one 256-lane (v6e/v7x MXU-width) output group; G must divide 128.
    group = 1
    while group < 128 and 2 * group * hid_dim <= 256:
        group *= 2
    lane_w = group * hid_dim          # lanes per scalar group (256 for hid_dim=32)
    chunks = 128 // group             # scalar groups per lane-dense x row
    out_w = chunks * lane_w           # = 128 * hid_dim

    # Lane-dense x: flat scalar stream, padded to a multiple of 128.
    RX = pl.cdiv(N, 128)
    n_pad = RX * 128
    x_flat = x.reshape(-1).astype(jnp.float32)
    if n_pad != N:                    # static check; pad only the small input
        x_flat = jnp.pad(x_flat, (0, n_pad - N))
    xd = x_flat.reshape(RX, 128)

    # Packed parameters, K ordered [j, g] (j = int_dim index, g = group index).
    w1t = jnp.repeat(w1.reshape(-1).astype(jnp.float32), group).reshape(1, int_dim * group)
    b1t = jnp.repeat(b1.astype(jnp.float32), group).reshape(1, int_dim * group)
    eye_g = jnp.eye(group, dtype=jnp.float32)
    w2p = (w2.astype(jnp.float32)[:, None, None, :] * eye_g[None, :, :, None])
    w2p = w2p.reshape(int_dim * group, lane_w).astype(jnp.bfloat16)

    # Row tile: full extent if it fits one block, else a multiple of 8 (sublane align).
    if RX <= block_rows:
        trx = RX
    else:
        trx = max(8, (block_rows // 8) * 8)
    grid = pl.cdiv(RX, trx)

    # Advisory cost estimate reflecting real (lane-dense) traffic.
    flops = N * (2 * int_dim * hid_dim + 4 * int_dim)
    bytes_accessed = (xd.size * 4 + RX * out_w * 4
                      + w1t.size * 4 + b1t.size * 4 + w2p.size * 2)
    cost = pl.CostEstimate(flops=flops, transcendentals=N * int_dim,
                           bytes_accessed=bytes_accessed)

    kernel = partial(cve_kernel, group=group, int_dim=int_dim, chunks=chunks,
                     lane_w=lane_w)

    out = pl.pallas_call(
        kernel,
        out_shape=jax.ShapeDtypeStruct((RX, out_w), jnp.float32),
        grid_spec=pltpu.PrefetchScalarGridSpec(
            num_scalar_prefetch=0,
            grid=(grid,),
            in_specs=[
                pl.BlockSpec((trx, 128), lambda i: (i, 0)),
                pl.BlockSpec((1, int_dim * group), lambda i: (0, 0)),
                pl.BlockSpec((1, int_dim * group), lambda i: (0, 0)),
                pl.BlockSpec((int_dim * group, lane_w), lambda i: (0, 0)),
            ],
            out_specs=pl.BlockSpec((trx, out_w), lambda i: (i, 0)),
        ),
        compiler_params=pltpu.CompilerParams(
            dimension_semantics=("parallel",),
            vmem_limit_bytes=48 * 1024 * 1024,
        ),
        cost_estimate=cost,
    )(xd, w1t, b1t, w2p)

    # (RX, 128*hid_dim) row-major == (RX*128, hid_dim) row-major: reshape is free.
    out_flat = out.reshape(n_pad, hid_dim)
    if n_pad != N:                    # static check; slice only when padded
        out_flat = out_flat[:N]
    return out_flat.reshape(B, S, hid_dim)


def xavier_uniform(key, shape):
    fan_in, fan_out = shape[0], shape[1]
    bound = math.sqrt(6.0 / (fan_in + fan_out))
    return jax.random.uniform(key, shape, jnp.float32, -bound, bound)


def cve_reference(x, w1, b1, w2):
    h = jnp.tanh(jnp.matmul(x[..., None], w1) + b1[None, None, :])
    return jnp.matmul(h, w2)


if __name__ == "__main__":
    # Module hyperparameters: hid_dim = 32 -> int_dim = int(sqrt(32)) = 5
    hid_dim = 32
    int_dim = int(math.isqrt(hid_dim))
    B, S = 2, 8

    key = jax.random.PRNGKey(0)
    kx, kw1, kb1, kw2, kx2, kx3 = jax.random.split(key, 6)

    x = jax.random.normal(kx, (B, S), dtype=jnp.float32)
    W1 = xavier_uniform(kw1, (1, int_dim))
    b1 = 0.1 * jax.random.normal(kb1, (int_dim,), dtype=jnp.float32)  # exercise bias path
    W2 = xavier_uniform(kw2, (int_dim, hid_dim))

    # bf16 h / W2 on the MXU -> ~1e-3-level absolute error vs the f32 reference.
    TOL = dict(atol=2e-2, rtol=2e-2)

    out = jax.block_until_ready(cve_forward(x, W1, b1, W2))
    ref = cve_reference(x, W1, b1, W2)
    assert out.shape == (B, S, hid_dim)
    assert jnp.allclose(out, ref, **TOL)

    # N not a multiple of 128 -> exercises the pad/slice path (single block).
    x2 = jax.random.normal(kx2, (3, 70), dtype=jnp.float32)      # N = 210 -> RX = 2
    out2 = jax.block_until_ready(cve_forward(x2, W1, b1, W2))
    ref2 = cve_reference(x2, W1, b1, W2)
    assert out2.shape == (3, 70, hid_dim)
    assert jnp.allclose(out2, ref2, **TOL)

    # Multi-block grid with a ragged last row-block (RX = 11, trx = 8 -> grid = 2).
    x3 = jax.random.normal(kx3, (4, 352), dtype=jnp.float32)     # N = 1408
    out3 = jax.block_until_ready(cve_forward(x3, W1, b1, W2, block_rows=8))
    ref3 = cve_reference(x3, W1, b1, W2)
    assert out3.shape == (4, 352, hid_dim)
    assert jnp.allclose(out3, ref3, **TOL)

    print("KERNEL_OK")
</pallas_src>

<mosaic_0001>
module attributes {stable_mosaic.version = 11 : i64} {
  func.func @cve_kernel(%arg0: i32, %arg1: memref<1x128xf32, #tpu.memory_space<vmem>>, %arg2: memref<1x40xf32, #tpu.memory_space<vmem>>, %arg3: memref<1x40xf32, #tpu.memory_space<vmem>>, %arg4: memref<40x256xbf16, #tpu.memory_space<vmem>>, %arg5: memref<1x4096xf32, #tpu.memory_space<vmem>>) attributes {dimension_semantics = [#tpu.dimension_semantics<parallel>], iteration_bounds = array<i64: 1>, scalar_prefetch = 0 : i64, scratch_operands = 0 : i64, tpu.core_type = #tpu.core_type<tc>, window_params = [{transform_indices = @transform_0, window_bounds = array<i64: 1, 128>}, {pipeline_mode = #tpu.pipeline_mode<synchronous>, transform_indices = @transform_1, window_bounds = array<i64: 1, 40>}, {pipeline_mode = #tpu.pipeline_mode<synchronous>, transform_indices = @transform_2, window_bounds = array<i64: 1, 40>}, {pipeline_mode = #tpu.pipeline_mode<synchronous>, transform_indices = @transform_3, window_bounds = array<i64: 40, 256>}, {transform_indices = @transform_4, window_bounds = array<i64: 1, 4096>}]} {
    %c0 = arith.constant 0 : index
    %c0_0 = arith.constant 0 : index
    %0 = vector.load %arg2[%c0, %c0_0] : memref<1x40xf32, #tpu.memory_space<vmem>>, vector<1x40xf32>
    %c0_1 = arith.constant 0 : index
    %c0_2 = arith.constant 0 : index
    %1 = vector.load %arg3[%c0_1, %c0_2] : memref<1x40xf32, #tpu.memory_space<vmem>>, vector<1x40xf32>
    %c0_3 = arith.constant 0 : index
    %c0_4 = arith.constant 0 : index
    %2 = vector.load %arg4[%c0_3, %c0_4] : memref<40x256xbf16, #tpu.memory_space<vmem>>, vector<40x256xbf16>
    %c0_5 = arith.constant 0 : index
    %c0_6 = arith.constant 0 : index
    %3 = vector.load %arg1[%c0_5, %c0_6] : memref<1x128xf32, #tpu.memory_space<vmem>>, vector<1x8xf32>
    %4 = tpu.concatenate %3, %3, %3, %3, %3 in 1 : vector<1x8xf32>, vector<1x8xf32>, vector<1x8xf32>, vector<1x8xf32>, vector<1x8xf32> -> vector<1x40xf32>
    %5 = arith.mulf %4, %0 : vector<1x40xf32>
    %6 = arith.addf %5, %1 : vector<1x40xf32>
    %7 = math.tanh %6 : vector<1x40xf32>
    %8 = arith.truncf %7 : vector<1x40xf32> to vector<1x40xbf16>
    %cst = arith.constant dense<0.000000e+00> : vector<1x256xf32>
    %9 = tpu.matmul %8, %2, %cst {dimension_numbers = #tpu.dot_dimension_numbers<[1], [0], [0], [1], [0, 0, 1, 1], [], []>} : vector<1x40xbf16>, vector<40x256xbf16>, vector<1x256xf32> -> vector<1x256xf32>
    %c0_7 = arith.constant 0 : index
    %c0_8 = arith.constant 0 : index
    %10 = vector.load %arg5[%c0_7, %c0_8] : memref<1x4096xf32, #tpu.memory_space<vmem>>, vector<1x256xf32>
    tpu.vector_store %arg5[%c0_7, %c0_8], %9 {strides = array<i32>} : memref<1x4096xf32, #tpu.memory_space<vmem>>, vector<1x256xf32>,
    %c0_9 = arith.constant 0 : index
    %c8 = arith.constant 8 : index
    %11 = vector.load %arg1[%c0_9, %c8] : memref<1x128xf32, #tpu.memory_space<vmem>>, vector<1x8xf32>
    %12 = tpu.concatenate %11, %11, %11, %11, %11 in 1 : vector<1x8xf32>, vector<1x8xf32>, vector<1x8xf32>, vector<1x8xf32>, vector<1x8xf32> -> vector<1x40xf32>
    %13 = arith.mulf %12, %0 : vector<1x40xf32>
    %14 = arith.addf %13, %1 : vector<1x40xf32>
    %15 = math.tanh %14 : vector<1x40xf32>
    %16 = arith.truncf %15 : vector<1x40xf32> to vector<1x40xbf16>
    %cst_10 = arith.constant dense<0.000000e+00> : vector<1x256xf32>
    %17 = tpu.matmul %16, %2, %cst_10 {dimension_numbers = #tpu.dot_dimension_numbers<[1], [0], [0], [1], [0, 0, 1, 1], [], []>} : vector<1x40xbf16>, vector<40x256xbf16>, vector<1x256xf32> -> vector<1x256xf32>
    %c0_11 = arith.constant 0 : index
    %c256 = arith.constant 256 : index
    %18 = vector.load %arg5[%c0_11, %c256] : memref<1x4096xf32, #tpu.memory_space<vmem>>, vector<1x256xf32>
    tpu.vector_store %arg5[%c0_11, %c256], %17 {strides = array<i32>} : memref<1x4096xf32, #tpu.memory_space<vmem>>, vector<1x256xf32>,
    %c0_12 = arith.constant 0 : index
    %c16 = arith.constant 16 : index
    %19 = vector.load %arg1[%c0_12, %c16] : memref<1x128xf32, #tpu.memory_space<vmem>>, vector<1x8xf32>
    %20 = tpu.concatenate %19, %19, %19, %19, %19 in 1 : vector<1x8xf32>, vector<1x8xf32>, vector<1x8xf32>, vector<1x8xf32>, vector<1x8xf32> -> vector<1x40xf32>
    %21 = arith.mulf %20, %0 : vector<1x40xf32>
    %22 = arith.addf %21, %1 : vector<1x40xf32>
    %23 = math.tanh %22 : vector<1x40xf32>
    %24 = arith.truncf %23 : vector<1x40xf32> to vector<1x40xbf16>
    %cst_13 = arith.constant dense<0.000000e+00> : vector<1x256xf32>
    %25 = tpu.matmul %24, %2, %cst_13 {dimension_numbers = #tpu.dot_dimension_numbers<[1], [0], [0], [1], [0, 0, 1, 1], [], []>} : vector<1x40xbf16>, vector<40x256xbf16>, vector<1x256xf32> -> vector<1x256xf32>
    %c0_14 = arith.constant 0 : index
    %c512 = arith.constant 512 : index
    %26 = vector.load %arg5[%c0_14, %c512] : memref<1x4096xf32, #tpu.memory_space<vmem>>, vector<1x256xf32>
    tpu.vector_store %arg5[%c0_14, %c512], %25 {strides = array<i32>} : memref<1x4096xf32, #tpu.memory_space<vmem>>, vector<1x256xf32>,
    %c0_15 = arith.constant 0 : index
    %c24 = arith.constant 24 : index
    %27 = vector.load %arg1[%c0_15, %c24] : memref<1x128xf32, #tpu.memory_space<vmem>>, vector<1x8xf32>
    %28 = tpu.concatenate %27, %27, %27, %27, %27 in 1 : vector<1x8xf32>, vector<1x8xf32>, vector<1x8xf32>, vector<1x8xf32>, vector<1x8xf32> -> vector<1x40xf32>
    %29 = arith.mulf %28, %0 : vector<1x40xf32>
    %30 = arith.addf %29, %1 : vector<1x40xf32>
    %31 = math.tanh %30 : vector<1x40xf32>
    %32 = arith.truncf %31 : vector<1x40xf32> to vector<1x40xbf16>
    %cst_16 = arith.constant dense<0.000000e+00> : vector<1x256xf32>
    %33 = tpu.matmul %32, %2, %cst_16 {dimension_numbers = #tpu.dot_dimension_numbers<[1], [0], [0], [1], [0, 0, 1, 1], [], []>} : vector<1x40xbf16>, vector<40x256xbf16>, vector<1x256xf32> -> vector<1x256xf32>
    %c0_17 = arith.constant 0 : index
    %c768 = arith.constant 768 : index
    %34 = vector.load %arg5[%c0_17, %c768] : memref<1x4096xf32, #tpu.memory_space<vmem>>, vector<1x256xf32>
    tpu.vector_store %arg5[%c0_17, %c768], %33 {strides = array<i32>} : memref<1x4096xf32, #tpu.memory_space<vmem>>, vector<1x256xf32>,
    %c0_18 = arith.constant 0 : index
    %c32 = arith.constant 32 : index
    %35 = vector.load %arg1[%c0_18, %c32] : memref<1x128xf32, #tpu.memory_space<vmem>>, vector<1x8xf32>
    %36 = tpu.concatenate %35, %35, %35, %35, %35 in 1 : vector<1x8xf32>, vector<1x8xf32>, vector<1x8xf32>, vector<1x8xf32>, vector<1x8xf32> -> vector<1x40xf32>
    %37 = arith.mulf %36, %0 : vector<1x40xf32>
    %38 = arith.addf %37, %1 : vector<1x40xf32>
    %39 = math.tanh %38 : vector<1x40xf32>
    %40 = arith.truncf %39 : vector<1x40xf32> to vector<1x40xbf16>
    %cst_19 = arith.constant dense<0.000000e+00> : vector<1x256xf32>
    %41 = tpu.matmul %40, %2, %cst_19 {dimension_numbers = #tpu.dot_dimension_numbers<[1], [0], [0], [1], [0, 0, 1, 1], [], []>} : vector<1x40xbf16>, vector<40x256xbf16>, vector<1x256xf32> -> vector<1x256xf32>
    %c0_20 = arith.constant 0 : index
    %c1024 = arith.constant 1024 : index
    %42 = vector.load %arg5[%c0_20, %c1024] : memref<1x4096xf32, #tpu.memory_space<vmem>>, vector<1x256xf32>
    tpu.vector_store %arg5[%c0_20, %c1024], %41 {strides = array<i32>} : memref<1x4096xf32, #tpu.memory_space<vmem>>, vector<1x256xf32>,
    %c0_21 = arith.constant 0 : index
    %c40 = arith.constant 40 : index
    %43 = vector.load %arg1[%c0_21, %c40] : memref<1x128xf32, #tpu.memory_space<vmem>>, vector<1x8xf32>
    %44 = tpu.concatenate %43, %43, %43, %43, %43 in 1 : vector<1x8xf32>, vector<1x8xf32>, vector<1x8xf32>, vector<1x8xf32>, vector<1x8xf32> -> vector<1x40xf32>
    %45 = arith.mulf %44, %0 : vector<1x40xf32>
    %46 = arith.addf %45, %1 : vector<1x40xf32>
    %47 = math.tanh %46 : vector<1x40xf32>
    %48 = arith.truncf %47 : vector<1x40xf32> to vector<1x40xbf16>
    %cst_22 = arith.constant dense<0.000000e+00> : vector<1x256xf32>
    %49 = tpu.matmul %48, %2, %cst_22 {dimension_numbers = #tpu.dot_dimension_numbers<[1], [0], [0], [1], [0, 0, 1, 1], [], []>} : vector<1x40xbf16>, vector<40x256xbf16>, vector<1x256xf32> -> vector<1x256xf32>
    %c0_23 = arith.constant 0 : index
    %c1280 = arith.constant 1280 : index
    %50 = vector.load %arg5[%c0_23, %c1280] : memref<1x4096xf32, #tpu.memory_space<vmem>>, vector<1x256xf32>
    tpu.vector_store %arg5[%c0_23, %c1280], %49 {strides = array<i32>} : memref<1x4096xf32, #tpu.memory_space<vmem>>, vector<1x256xf32>,
    %c0_24 = arith.constant 0 : index
    %c48 = arith.constant 48 : index
    %51 = vector.load %arg1[%c0_24, %c48] : memref<1x128xf32, #tpu.memory_space<vmem>>, vector<1x8xf32>
    %52 = tpu.concatenate %51, %51, %51, %51, %51 in 1 : vector<1x8xf32>, vector<1x8xf32>, vector<1x8xf32>, vector<1x8xf32>, vector<1x8xf32> -> vector<1x40xf32>
    %53 = arith.mulf %52, %0 : vector<1x40xf32>
    %54 = arith.addf %53, %1 : vector<1x40xf32>
    %55 = math.tanh %54 : vector<1x40xf32>
    %56 = arith.truncf %55 : vector<1x40xf32> to vector<1x40xbf16>
    %cst_25 = arith.constant dense<0.000000e+00> : vector<1x256xf32>
    %57 = tpu.matmul %56, %2, %cst_25 {dimension_numbers = #tpu.dot_dimension_numbers<[1], [0], [0], [1], [0, 0, 1, 1], [], []>} : vector<1x40xbf16>, vector<40x256xbf16>, vector<1x256xf32> -> vector<1x256xf32>
    %c0_26 = arith.constant 0 : index
    %c1536 = arith.constant 1536 : index
    %58 = vector.load %arg5[%c0_26, %c1536] : memref<1x4096xf32, #tpu.memory_space<vmem>>, vector<1x256xf32>
    tpu.vector_store %arg5[%c0_26, %c1536], %57 {strides = array<i32>} : memref<1x4096xf32, #tpu.memory_space<vmem>>, vector<1x256xf32>,
    %c0_27 = arith.constant 0 : index
    %c56 = arith.constant 56 : index
    %59 = vector.load %arg1[%c0_27, %c56] : memref<1x128xf32, #tpu.memory_space<vmem>>, vector<1x8xf32>
    %60 = tpu.concatenate %59, %59, %59, %59, %59 in 1 : vector<1x8xf32>, vector<1x8xf32>, vector<1x8xf32>, vector<1x8xf32>, vector<1x8xf32> -> vector<1x40xf32>
    %61 = arith.mulf %60, %0 : vector<1x40xf32>
    %62 = arith.addf %61, %1 : vector<1x40xf32>
    %63 = math.tanh %62 : vector<1x40xf32>
    %64 = arith.truncf %63 : vector<1x40xf32> to vector<1x40xbf16>
    %cst_28 = arith.constant dense<0.000000e+00> : vector<1x256xf32>
    %65 = tpu.matmul %64, %2, %cst_28 {dimension_numbers = #tpu.dot_dimension_numbers<[1], [0], [0], [1], [0, 0, 1, 1], [], []>} : vector<1x40xbf16>, vector<40x256xbf16>, vector<1x256xf32> -> vector<1x256xf32>
    %c0_29 = arith.constant 0 : index
    %c1792 = arith.constant 1792 : index
    %66 = vector.load %arg5[%c0_29, %c1792] : memref<1x4096xf32, #tpu.memory_space<vmem>>, vector<1x256xf32>
    tpu.vector_store %arg5[%c0_29, %c1792], %65 {strides = array<i32>} : memref<1x4096xf32, #tpu.memory_space<vmem>>, vector<1x256xf32>,
    %c0_30 = arith.constant 0 : index
    %c64 = arith.constant 64 : index
    %67 = vector.load %arg1[%c0_30, %c64] : memref<1x128xf32, #tpu.memory_space<vmem>>, vector<1x8xf32>
    %68 = tpu.concatenate %67, %67, %67, %67, %67 in 1 : vector<1x8xf32>, vector<1x8xf32>, vector<1x8xf32>, vector<1x8xf32>, vector<1x8xf32> -> vector<1x40xf32>
    %69 = arith.mulf %68, %0 : vector<1x40xf32>
    %70 = arith.addf %69, %1 : vector<1x40xf32>
    %71 = math.tanh %70 : vector<1x40xf32>
    %72 = arith.truncf %71 : vector<1x40xf32> to vector<1x40xbf16>
    %cst_31 = arith.constant dense<0.000000e+00> : vector<1x256xf32>
    %73 = tpu.matmul %72, %2, %cst_31 {dimension_numbers = #tpu.dot_dimension_numbers<[1], [0], [0], [1], [0, 0, 1, 1], [], []>} : vector<1x40xbf16>, vector<40x256xbf16>, vector<1x256xf32> -> vector<1x256xf32>
    %c0_32 = arith.constant 0 : index
    %c2048 = arith.constant 2048 : index
    %74 = vector.load %arg5[%c0_32, %c2048] : memref<1x4096xf32, #tpu.memory_space<vmem>>, vector<1x256xf32>
    tpu.vector_store %arg5[%c0_32, %c2048], %73 {strides = array<i32>} : memref<1x4096xf32, #tpu.memory_space<vmem>>, vector<1x256xf32>,
    %c0_33 = arith.constant 0 : index
    %c72 = arith.constant 72 : index
    %75 = vector.load %arg1[%c0_33, %c72] : memref<1x128xf32, #tpu.memory_space<vmem>>, vector<1x8xf32>
    %76 = tpu.concatenate %75, %75, %75, %75, %75 in 1 : vector<1x8xf32>, vector<1x8xf32>, vector<1x8xf32>, vector<1x8xf32>, vector<1x8xf32> -> vector<1x40xf32>
    %77 = arith.mulf %76, %0 : vector<1x40xf32>
    %78 = arith.addf %77, %1 : vector<1x40xf32>
    %79 = math.tanh %78 : vector<1x40xf32>
    %80 = arith.truncf %79 : vector<1x40xf32> to vector<1x40xbf16>
    %cst_34 = arith.constant dense<0.000000e+00> : vector<1x256xf32>
    %81 = tpu.matmul %80, %2, %cst_34 {dimension_numbers = #tpu.dot_dimension_numbers<[1], [0], [0], [1], [0, 0, 1, 1], [], []>} : vector<1x40xbf16>, vector<40x256xbf16>, vector<1x256xf32> -> vector<1x256xf32>
    %c0_35 = arith.constant 0 : index
    %c2304 = arith.constant 2304 : index
    %82 = vector.load %arg5[%c0_35, %c2304] : memref<1x4096xf32, #tpu.memory_space<vmem>>, vector<1x256xf32>
    tpu.vector_store %arg5[%c0_35, %c2304], %81 {strides = array<i32>} : memref<1x4096xf32, #tpu.memory_space<vmem>>, vector<1x256xf32>,
    %c0_36 = arith.constant 0 : index
    %c80 = arith.constant 80 : index
    %83 = vector.load %arg1[%c0_36, %c80] : memref<1x128xf32, #tpu.memory_space<vmem>>, vector<1x8xf32>
    %84 = tpu.concatenate %83, %83, %83, %83, %83 in 1 : vector<1x8xf32>, vector<1x8xf32>, vector<1x8xf32>, vector<1x8xf32>, vector<1x8xf32> -> vector<1x40xf32>
    %85 = arith.mulf %84, %0 : vector<1x40xf32>
    %86 = arith.addf %85, %1 : vector<1x40xf32>
    %87 = math.tanh %86 : vector<1x40xf32>
    %88 = arith.truncf %87 : vector<1x40xf32> to vector<1x40xbf16>
    %cst_37 = arith.constant dense<0.000000e+00> : vector<1x256xf32>
    %89 = tpu.matmul %88, %2, %cst_37 {dimension_numbers = #tpu.dot_dimension_numbers<[1], [0], [0], [1], [0, 0, 1, 1], [], []>} : vector<1x40xbf16>, vector<40x256xbf16>, vector<1x256xf32> -> vector<1x256xf32>
    %c0_38 = arith.constant 0 : index
    %c2560 = arith.constant 2560 : index
    %90 = vector.load %arg5[%c0_38, %c2560] : memref<1x4096xf32, #tpu.memory_space<vmem>>, vector<1x256xf32>
    tpu.vector_store %arg5[%c0_38, %c2560], %89 {strides = array<i32>} : memref<1x4096xf32, #tpu.memory_space<vmem>>, vector<1x256xf32>,
    %c0_39 = arith.constant 0 : index
    %c88 = arith.constant 88 : index
    %91 = vector.load %arg1[%c0_39, %c88] : memref<1x128xf32, #tpu.memory_space<vmem>>, vector<1x8xf32>
    %92 = tpu.concatenate %91, %91, %91, %91, %91 in 1 : vector<1x8xf32>, vector<1x8xf32>, vector<1x8xf32>, vector<1x8xf32>, vector<1x8xf32> -> vector<1x40xf32>
    %93 = arith.mulf %92, %0 : vector<1x40xf32>
    %94 = arith.addf %93, %1 : vector<1x40xf32>
    %95 = math.tanh %94 : vector<1x40xf32>
    %96 = arith.truncf %95 : vector<1x40xf32> to vector<1x40xbf16>
    %cst_40 = arith.constant dense<0.000000e+00> : vector<1x256xf32>
    %97 = tpu.matmul %96, %2, %cst_40 {dimension_numbers = #tpu.dot_dimension_numbers<[1], [0], [0], [1], [0, 0, 1, 1], [], []>} : vector<1x40xbf16>, vector<40x256xbf16>, vector<1x256xf32> -> vector<1x256xf32>
    %c0_41 = arith.constant 0 : index
    %c2816 = arith.constant 2816 : index
    %98 = vector.load %arg5[%c0_41, %c2816] : memref<1x4096xf32, #tpu.memory_space<vmem>>, vector<1x256xf32>
    tpu.vector_store %arg5[%c0_41, %c2816], %97 {strides = array<i32>} : memref<1x4096xf32, #tpu.memory_space<vmem>>, vector<1x256xf32>,
    %c0_42 = arith.constant 0 : index
    %c96 = arith.constant 96 : index
    %99 = vector.load %arg1[%c0_42, %c96] : memref<1x128xf32, #tpu.memory_space<vmem>>, vector<1x8xf32>
    %100 = tpu.concatenate %99, %99, %99, %99, %99 in 1 : vector<1x8xf32>, vector<1x8xf32>, vector<1x8xf32>, vector<1x8xf32>, vector<1x8xf32> -> vector<1x40xf32>
    %101 = arith.mulf %100, %0 : vector<1x40xf32>
    %102 = arith.addf %101, %1 : vector<1x40xf32>
    %103 = math.tanh %102 : vector<1x40xf32>
    %104 = arith.truncf %103 : vector<1x40xf32> to vector<1x40xbf16>
    %cst_43 = arith.constant dense<0.000000e+00> : vector<1x256xf32>
    %105 = tpu.matmul %104, %2, %cst_43 {dimension_numbers = #tpu.dot_dimension_numbers<[1], [0], [0], [1], [0, 0, 1, 1], [], []>} : vector<1x40xbf16>, vector<40x256xbf16>, vector<1x256xf32> -> vector<1x256xf32>
    %c0_44 = arith.constant 0 : index
    %c3072 = arith.constant 3072 : index
    %106 = vector.load %arg5[%c0_44, %c3072] : memref<1x4096xf32, #tpu.memory_space<vmem>>, vector<1x256xf32>
    tpu.vector_store %arg5[%c0_44, %c3072], %105 {strides = array<i32>} : memref<1x4096xf32, #tpu.memory_space<vmem>>, vector<1x256xf32>,
    %c0_45 = arith.constant 0 : index
    %c104 = arith.constant 104 : index
    %107 = vector.load %arg1[%c0_45, %c104] : memref<1x128xf32, #tpu.memory_space<vmem>>, vector<1x8xf32>
    %108 = tpu.concatenate %107, %107, %107, %107, %107 in 1 : vector<1x8xf32>, vector<1x8xf32>, vector<1x8xf32>, vector<1x8xf32>, vector<1x8xf32> -> vector<1x40xf32>
    %109 = arith.mulf %108, %0 : vector<1x40xf32>
    %110 = arith.addf %109, %1 : vector<1x40xf32>
    %111 = math.tanh %110 : vector<1x40xf32>
    %112 = arith.truncf %111 : vector<1x40xf32> to vector<1x40xbf16>
    %cst_46 = arith.constant dense<0.000000e+00> : vector<1x256xf32>
    %113 = tpu.matmul %112, %2, %cst_46 {dimension_numbers = #tpu.dot_dimension_numbers<[1], [0], [0], [1], [0, 0, 1, 1], [], []>} : vector<1x40xbf16>, vector<40x256xbf16>, vector<1x256xf32> -> vector<1x256xf32>
    %c0_47 = arith.constant 0 : index
    %c3328 = arith.constant 3328 : index
    %114 = vector.load %arg5[%c0_47, %c3328] : memref<1x4096xf32, #tpu.memory_space<vmem>>, vector<1x256xf32>
    tpu.vector_store %arg5[%c0_47, %c3328], %113 {strides = array<i32>} : memref<1x4096xf32, #tpu.memory_space<vmem>>, vector<1x256xf32>,
    %c0_48 = arith.constant 0 : index
    %c112 = arith.constant 112 : index
    %115 = vector.load %arg1[%c0_48, %c112] : memref<1x128xf32, #tpu.memory_space<vmem>>, vector<1x8xf32>
    %116 = tpu.concatenate %115, %115, %115, %115, %115 in 1 : vector<1x8xf32>, vector<1x8xf32>, vector<1x8xf32>, vector<1x8xf32>, vector<1x8xf32> -> vector<1x40xf32>
    %117 = arith.mulf %116, %0 : vector<1x40xf32>
    %118 = arith.addf %117, %1 : vector<1x40xf32>
    %119 = math.tanh %118 : vector<1x40xf32>
    %120 = arith.truncf %119 : vector<1x40xf32> to vector<1x40xbf16>
    %cst_49 = arith.constant dense<0.000000e+00> : vector<1x256xf32>
    %121 = tpu.matmul %120, %2, %cst_49 {dimension_numbers = #tpu.dot_dimension_numbers<[1], [0], [0], [1], [0, 0, 1, 1], [], []>} : vector<1x40xbf16>, vector<40x256xbf16>, vector<1x256xf32> -> vector<1x256xf32>
    %c0_50 = arith.constant 0 : index
    %c3584 = arith.constant 3584 : index
    %122 = vector.load %arg5[%c0_50, %c3584] : memref<1x4096xf32, #tpu.memory_space<vmem>>, vector<1x256xf32>
    tpu.vector_store %arg5[%c0_50, %c3584], %121 {strides = array<i32>} : memref<1x4096xf32, #tpu.memory_space<vmem>>, vector<1x256xf32>,
    %c0_51 = arith.constant 0 : index
    %c120 = arith.constant 120 : index
    %123 = vector.load %arg1[%c0_51, %c120] : memref<1x128xf32, #tpu.memory_space<vmem>>, vector<1x8xf32>
    %124 = tpu.concatenate %123, %123, %123, %123, %123 in 1 : vector<1x8xf32>, vector<1x8xf32>, vector<1x8xf32>, vector<1x8xf32>, vector<1x8xf32> -> vector<1x40xf32>
    %125 = arith.mulf %124, %0 : vector<1x40xf32>
    %126 = arith.addf %125, %1 : vector<1x40xf32>
    %127 = math.tanh %126 : vector<1x40xf32>
    %128 = arith.truncf %127 : vector<1x40xf32> to vector<1x40xbf16>
    %cst_52 = arith.constant dense<0.000000e+00> : vector<1x256xf32>
    %129 = tpu.matmul %128, %2, %cst_52 {dimension_numbers = #tpu.dot_dimension_numbers<[1], [0], [0], [1], [0, 0, 1, 1], [], []>} : vector<1x40xbf16>, vector<40x256xbf16>, vector<1x256xf32> -> vector<1x256xf32>
    %c0_53 = arith.constant 0 : index
    %c3840 = arith.constant 3840 : index
    %130 = vector.load %arg5[%c0_53, %c3840] : memref<1x4096xf32, #tpu.memory_space<vmem>>, vector<1x256xf32>
    tpu.vector_store %arg5[%c0_53, %c3840], %129 {strides = array<i32>} : memref<1x4096xf32, #tpu.memory_space<vmem>>, vector<1x256xf32>,
    return
  }
  func.func @transform_0(%arg0: i32) -> (i32, i32) {
    %c0_i32 = arith.constant 0 : i32
    %c0_i32_0 = arith.constant 0 : i32
    return %arg0, %c0_i32 : i32, i32
  }
  func.func @transform_1(%arg0: i32) -> (i32, i32) {
    %c0_i32 = arith.constant 0 : i32
    %c0_i32_0 = arith.constant 0 : i32
    %c0_i32_1 = arith.constant 0 : i32
    return %c0_i32, %c0_i32_0 : i32, i32
  }
  func.func @transform_2(%arg0: i32) -> (i32, i32) {
    %c0_i32 = arith.constant 0 : i32
    %c0_i32_0 = arith.constant 0 : i32
    %c0_i32_1 = arith.constant 0 : i32
    return %c0_i32, %c0_i32_0 : i32, i32
  }
  func.func @transform_3(%arg0: i32) -> (i32, i32) {
    %c0_i32 = arith.constant 0 : i32
    %c0_i32_0 = arith.constant 0 : i32
    %c0_i32_1 = arith.constant 0 : i32
    return %c0_i32, %c0_i32_0 : i32, i32
  }
  func.func @transform_4(%arg0: i32) -> (i32, i32) {
    %c0_i32 = arith.constant 0 : i32
    %c0_i32_0 = arith.constant 0 : i32
    return %arg0, %c0_i32 : i32, i32
  }
}

</mosaic_0001>

<bundles_post_ra>
// kernel: tpu_custom_call.1
= control target key start
LH: loop header
LB: loop body
LE: loop exit
PB: predicated region body
PF: predicated region fallthrough
CT: control target
= control target key end

     0   :  { %9 = vsyncpa [#allocation3], 0  ;;  %s2329_s0 = inlined_call_operand.hbm [shape: f32[1,128], index: 0, kind: input, shape index: {}]   ;;  %s2330_s1 = inlined_call_operand.vmem [shape: f32[1,40], index: 1, kind: input, shape index: {}]   ;;  %s2331_s2 = inlined_call_operand.vmem [shape: f32[1,40], index: 2, kind: input, shape index: {}]   ;;  %s2332_s3 = inlined_call_operand.hbm [shape: bf16[40,256], index: 3, kind: input, shape index: {}]   ;;  %s2333_s4 = inlined_call_operand.hbm [shape: f32[1,4096], index: 4, kind: output, shape index: {}]  }
   0x1   :  { %10 = vsyncpa [#allocation6], 0 }
   0x2   :  { %11 = vsyncpa [#allocation4], 0  ;;  %s1748_s15 = smov [#allocation2]   ;;  %s1749_s17 = smov [#allocation5]  }
   0x3   :  { %s18_s16 = sshll.u32 %s1748_s15, 4  ;;  %s31_s18 = sshll.u32 %s1749_s17, 4  ;;  %s19_s16 = int_to_ptr.vmem [resolvable:$true] %s18_s16  ;;  %s1794_s18 = int_to_ptr.vmem [resolvable:$true] %s31_s18 }
   0x4   :  { %s1676_s21 = scalar_lea.hbm %s2329_s0, 16 }
   0x5   :  { %p1677_p0 = scmp.ne.s32.totalorder %s2329_s0, %s1676_s21  ;;  %p1680_p1 = scmp.lt.u32.totalorder %s1676_s21, %s2329_s0 }
   0x7   :  { %p1682_p2 = pnand %p1680_p1, %p1677_p0 }
   0x9   :  { %1685 = shalt.err (!%p1682_p2)
}
   0xa   :  { %s1686_s26 = scalar_lea.vmem %s19_s16, 16  ;;  %s1690_s27 = scalar_lea.vmem %s19_s16, 32 }
   0xb   :  { %p1687_p3 = scmp.ne.s32.totalorder %s19_s16, %s1686_s26  ;;  %p1691_p4 = scmp.lt.s32.totalorder %s19_s16, %s19_s16 }
   0xc   :  { %p1692_p5 = scmp.lt.s32.totalorder %s1690_s27, %s1686_s26 }
   0xe   :  { %p1693_p6 = por %p1692_p5, %p1691_p4 }
  0x10   :  { %p1694_p7 = pnand %p1693_p6, %p1687_p3 }
  0x12   :  { %1697 = shalt.err (!%p1694_p7)
}
  0x13   :  { %21 = dma.hbm_to_vmem [thread:$0]  %s2329_s0, 16, %s19_s16, [#allocation3]  }
  0x14   :  { %s1698_s6 = scalar_lea.hbm %s2332_s3, 640 }
  0x15   :  { %p1699_p8 = scmp.ne.s32.totalorder %s2332_s3, %s1698_s6  ;;  %p1702_p9 = scmp.lt.u32.totalorder %s1698_s6, %s2332_s3 }
  0x17   :  { %p1704_p10 = pnand %p1702_p9, %p1699_p8 }
  0x19   :  { %1707 = shalt.err (!%p1704_p10)
}
  0x1a   :  { %s1708_s11 = scalar_lea.vmem %s1794_s18, 640  ;;  %p1713_p12 = scmp.lt.s32.totalorder %s1794_s18, %s1794_s18 }
  0x1b   :  { %p1709_p11 = scmp.ne.s32.totalorder %s1794_s18, %s1708_s11  ;;  %p1714_p13 = scmp.lt.s32.totalorder %s1708_s11, %s1708_s11 }
  0x1d   :  { %p1715_p0 = por %p1714_p13, %p1713_p12 }
  0x1f   :  { %p1716_p1 = pnand %p1715_p0, %p1709_p11 }
  0x21   :  { %1719 = shalt.err (!%p1716_p1)
}
  0x22   :  { %s1750_s0 = smov 128   ;;  %s1751_s12 = smov 8  }
  0x23   :  { %37 = dma.hbm_to_vmem [thread:$0]  %s2332_s3, 640, %s1794_s18, [#allocation6], %s1750_s0, %s1750_s0, %s1751_s12  }
  0x24   :  { %1742 = dma.done.wait [#allocation3], 16  }
  0x25   :  { %1743 = vsyncadd [#allocation3], 4294967280 }
  0x26   :  { %1744 = dma.done.wait [#allocation6], 640  }
  0x27   :  { %1745 = vsyncadd [#allocation6], 4294966656  ;;  %v54_v0 = vlaneseq  ;;  %v1830_v3 = vld [vmem:[#allocation2] sm:$0x1]  ;;  %s1752_s15 = smov 16   ;;  %s1753_s3 = smov 120  }
  0x28   :  { %v1832_v4 = vld [vmem:[#allocation2] sm:$0x1]  ;;  %v1840_v7 = vld [vmem:[#allocation5 + $0x4] ss:$8 sps:$4 sm:$0xff]   ;;  %v1842_v8 = vld [vmem:[#allocation5] ss:$8 sps:$4 sm:$0xff]  }
  0x29   :  { %v1827_v1 = vshrl.u32 %v54_v0, 7  ;;  %118 = vmatprep.subr.bf16.mxu0 %v1840_v7  ;;  %211 = vmatprep.subr.bf16.mxu1 %v1840_v7  ;;  %s1754_s16 = smov 24   ;;  %v1850_v9 = vld [vmem:[#allocation5 + $0x14] ss:$8 sps:$4 sm:$0xff]   ;;  %v1854_v11 = vld [vmem:[#allocation5 + $0x10] ss:$8 sps:$4 sm:$0xff]  }
  0x2a   :  { %119 = vmatpush1.bf16.msra.mxu0 %v1842_v8  ;;  %212 = vmatpush1.bf16.msra.mxu1 %v1842_v8  ;;  %v1852_v10 = vld [vmem:[#allocation2] sm:$0x1]  ;;  %v51_v12 = vld [vmem:[#allocation5 + $0x20] sm:$0xff]  ;;  %s1755_s17 = smov 32   ;;  %vm111_vm0 = vcmask 1043456   ;;  %s1756_s18 = smov 112  }
  0x2b   :  { %v56_v2 = vsub.s32 0, %v1827_v1  ;;  %120 = vmatprep.subr.bf16.mxu0 %v1850_v9  ;;  %213 = vmatprep.subr.bf16.mxu1 %v1850_v9  ;;  %v1863_v14 = vcombine.high %v51_v12, %v51_v12  ;;  %v1570_v15 = vcombine.low %v51_v12, %v51_v12  ;;  %v1865_v16 = vld [vmem:[#allocation2] sm:$0x1]  ;;  %v1757_v19 = vmov 0   ;;  %s1758_s19 = smov 104   ;;  %s1759_s20 = smov 96  }
  0x2c   :  { %150 = vmatprep.mubr.bf16.mxu0 %v1757_v19  ;;  %243 = vmatprep.mubr.bf16.mxu1 %v1757_v19  ;;  %v1887_v20 = vld [vmem:[#allocation2] sm:$0x1]  ;;  %s1760_s21 = smov 88   ;;  %s1761_s22 = smov 80   ;;  %vm70_vm1 = vcmask 64512   ;;  %vm72_vm2 = vcmask 130048  }
  0x2d   :  { %v57_v5 = vrot.slane %v1830_v3, %v56_v2  ;;  %v187_v6 = vrot.slane %v1832_v4, %v56_v2  ;;  %v276_v13 = vrot.slane %v1852_v10, %v56_v2  ;;  %v1872_v17 = vsel %vm111_vm0, %v1570_v15, 0  ;;  %v1894_v22 = vld [vmem:[#allocation2] ss:$0 sm:$0xff]  ;;  %s1762_s23 = smov 72   ;;  %s1763_s24 = smov 64  }
  0x2e   :  { %121 = vmatpush1.bf16.msra.mxu0 %v1854_v11  ;;  %214 = vmatpush1.bf16.msra.mxu1 %v1854_v11  ;;  %v365_v18 = vrot.slane %v1865_v16, %v56_v2  ;;  %v454_v21 = vrot.slane %v1887_v20, %v56_v2  ;;  %s1764_s25 = smov 56   ;;  %s1765_s26 = smov 48   ;;  %vm74_vm3 = vcmask 195584   ;;  %vm76_vm4 = vcmask 261120   ;;  %v1995_v33 = vld [vmem:[%s2330_s1] sm:$0x1] }
  0x2f   :  { %61 = vrot.lane.b32.xlu1 %v57_v5, %s1752_s15  ;;  %58 = vrot.lane.b32.xlu0 %v57_v5, %s1751_s12  ;;  %s1766_s27 = smov 40   ;;  %v2002_v38 = vld [vmem:[%s2331_s2] sm:$0x1]  ;;  %vm107_vm5 = vcmask 326656   ;;  %vm2250_vm6 = vcmp.lt.s32.totalorder %v54_v0, 256  ;;  %s1768_s1 = smov [#allocation7]  }
  0x30   :  { %1572 = vmatprep.subr.msk.bf16.mxu0 %vm111_vm0, %v1863_v14  ;;  %1574 = vmatprep.subr.msk.bf16.mxu1 %vm111_vm0, %v1863_v14  ;;  %s1556_s2 = sshll.u32 %s1768_s1, 4  ;;  %s1557_s2 = int_to_ptr.vmem [resolvable:$true] %s1556_s2 }
  0x31   :  { %s1720_s6 = scalar_lea.vmem %s1557_s2, 512  ;;  %p1725_p3 = scmp.lt.s32.totalorder %s1557_s2, %s1557_s2 }
  0x32   :  { %123 = vmatpush1.bf16.msra.mxu0 %v1872_v17  ;;  %216 = vmatpush1.bf16.msra.mxu1 %v1872_v17  ;;  %p1721_p2 = scmp.ne.s32.totalorder %s1557_s2, %s1720_s6  ;;  %p1726_p4 = scmp.lt.s32.totalorder %s1720_s6, %s1720_s6 }
  0x33   :  { %191 = vrot.lane.b32.xlu1 %v187_v6, %s1751_s12  ;;  %188 = vrot.lane.b32.xlu0 %v187_v6, %s1753_s3 }
  0x34   :  { %300 = vmatprep.subr.bf16.mxu0 %v1840_v7  ;;  %389 = vmatprep.subr.bf16.mxu1 %v1840_v7  ;;  %p1727_p5 = por %p1726_p4, %p1725_p3 }
  0x36   :  { %p1728_p6 = pnand %p1727_p5, %p1721_p2 }
  0x37   :  { %194 = vrot.lane.b32.xlu1 %v187_v6, %s1752_s15  ;;  %64 = vrot.lane.b32.xlu0 %v57_v5, %s1754_s16 }
  0x3b   :  { %197 = vrot.lane.b32.xlu1 %v187_v6, %s1754_s16  ;;  %67 = vrot.lane.b32.xlu0 %v57_v5, %s1755_s17 }
  0x3f   :  { %280 = vrot.lane.b32.xlu1 %v276_v13, %s1753_s3  ;;  %277 = vrot.lane.b32.xlu0 %v276_v13, %s1756_s18 }
  0x43   :  { %369 = vrot.lane.b32.xlu1 %v365_v18, %s1756_s18  ;;  %366 = vrot.lane.b32.xlu0 %v365_v18, %s1758_s19 }
  0x47   :  { %283 = vrot.lane.b32.xlu1 %v276_v13, %s1751_s12  ;;  %372 = vrot.lane.b32.xlu0 %v365_v18, %s1753_s3 }
  0x4b   :  { %375 = vrot.lane.b32.xlu1 %v365_v18, %s1751_s12  ;;  %286 = vrot.lane.b32.xlu0 %v276_v13, %s1752_s15 }
  0x4f   :  { %458 = vrot.lane.b32.xlu1 %v454_v21, %s1758_s19  ;;  %455 = vrot.lane.b32.xlu0 %v454_v21, %s1759_s20 }
  0x53   :  { %547 = vrot.lane.b32.xlu1 %v1894_v22, %s1759_s20  ;;  %544 = vrot.lane.b32.xlu0 %v1894_v22, %s1760_s21 }
  0x57   :  { %550 = vrot.lane.b32.xlu1 %v1894_v22, %s1758_s19  ;;  %461 = vrot.lane.b32.xlu0 %v454_v21, %s1756_s18 }
  0x5b   :  { %553 = vrot.lane.b32.xlu1 %v1894_v22, %s1756_s18  ;;  %464 = vrot.lane.b32.xlu0 %v454_v21, %s1753_s3 }
  0x5f   :  { %636 = vrot.lane.b32.xlu1 %v1894_v22, %s1761_s22  ;;  %556 = vrot.lane.b32.xlu0 %v1894_v22, %s1753_s3 }
  0x63   :  { %728 = vrot.lane.b32.xlu1 %v1894_v22, %s1762_s23  ;;  %639 = vrot.lane.b32.xlu0 %v1894_v22, %s1760_s21 }
  0x67   :  { %642 = vrot.lane.b32.xlu1 %v1894_v22, %s1759_s20  ;;  %731 = vrot.lane.b32.xlu0 %v1894_v22, %s1761_s22 }
  0x6b   :  { %645 = vrot.lane.b32.xlu1 %v1894_v22, %s1758_s19  ;;  %734 = vrot.lane.b32.xlu0 %v1894_v22, %s1760_s21 }
  0x6f   :  { %648 = vrot.lane.b32.xlu1 %v1894_v22, %s1756_s18  ;;  %737 = vrot.lane.b32.xlu0 %v1894_v22, %s1759_s20 }
  0x73   :  { %820 = vrot.lane.b32.xlu1 %v1894_v22, %s1763_s24  ;;  %740 = vrot.lane.b32.xlu0 %v1894_v22, %s1758_s19 }
  0x77   :  { %912 = vrot.lane.b32.xlu1 %v1894_v22, %s1764_s25  ;;  %823 = vrot.lane.b32.xlu0 %v1894_v22, %s1762_s23 }
  0x7b   :  { %826 = vrot.lane.b32.xlu1 %v1894_v22, %s1761_s22  ;;  %915 = vrot.lane.b32.xlu0 %v1894_v22, %s1763_s24 }
  0x7f   :  { %829 = vrot.lane.b32.xlu1 %v1894_v22, %s1760_s21  ;;  %918 = vrot.lane.b32.xlu0 %v1894_v22, %s1762_s23 }
  0x83   :  { %832 = vrot.lane.b32.xlu1 %v1894_v22, %s1759_s20  ;;  %921 = vrot.lane.b32.xlu0 %v1894_v22, %s1761_s22 }
  0x87   :  { %1004 = vrot.lane.b32.xlu1 %v1894_v22, %s1765_s26  ;;  %924 = vrot.lane.b32.xlu0 %v1894_v22, %s1760_s21 }
  0x8b   :  { %1096 = vrot.lane.b32.xlu1 %v1894_v22, %s1766_s27  ;;  %1007 = vrot.lane.b32.xlu0 %v1894_v22, %s1764_s25 }
  0x8f   :  { %1010 = vrot.lane.b32.xlu1 %v1894_v22, %s1763_s24  ;;  %1099 = vrot.lane.b32.xlu0 %v1894_v22, %s1765_s26 }
  0x93   :  { %1013 = vrot.lane.b32.xlu1 %v1894_v22, %s1762_s23  ;;  %1102 = vrot.lane.b32.xlu0 %v1894_v22, %s1764_s25 }
  0x97   :  { %1016 = vrot.lane.b32.xlu1 %v1894_v22, %s1761_s22  ;;  %1105 = vrot.lane.b32.xlu0 %v1894_v22, %s1763_s24 }
  0x9b   :  { %1188 = vrot.lane.b32.xlu1 %v1894_v22, %s1755_s17  ;;  %1108 = vrot.lane.b32.xlu0 %v1894_v22, %s1762_s23 }
  0x9f   :  { %1280 = vrot.lane.b32.xlu1 %v1894_v22, %s1754_s16  ;;  %1191 = vrot.lane.b32.xlu0 %v1894_v22, %s1766_s27 }
  0xa1   :  { %v62_v23 = vpop.permute.xlu1 %61  ;;  %v59_v24 = vpop.permute.xlu0 %58 }
  0xa2   :  { %v71_v27 = vsel %vm70_vm1, %v1830_v3, %v59_v24 }
  0xa3   :  { %1194 = vrot.lane.b32.xlu1 %v1894_v22, %s1765_s26  ;;  %1283 = vrot.lane.b32.xlu0 %v1894_v22, %s1755_s17  ;;  %v73_v32 = vsel %vm72_vm2, %v71_v27, %v62_v23 }
  0xa5   :  { %v192_v25 = vpop.permute.xlu1 %191  ;;  %v189_v26 = vpop.permute.xlu0 %188 }
  0xa6   :  { %v200_v28 = vsel %vm70_vm1, %v189_v26, %v1832_v4 }
  0xa7   :  { %1197 = vrot.lane.b32.xlu1 %v1894_v22, %s1764_s25  ;;  %1286 = vrot.lane.b32.xlu0 %v1894_v22, %s1766_s27  ;;  %v201_v31 = vsel %vm72_vm2, %v200_v28, %v192_v25 }
  0xa9   :  { %v195_v29 = vpop.permute.xlu1 %194  ;;  %v65_v30 = vpop.permute.xlu0 %64 }
  0xaa   :  { %v202_v34 = vsel %vm74_vm3, %v201_v31, %v195_v29  ;;  %v75_v35 = vsel %vm74_vm3, %v73_v32, %v65_v30 }
  0xab   :  { %1200 = vrot.lane.b32.xlu1 %v1894_v22, %s1763_s24  ;;  %1289 = vrot.lane.b32.xlu0 %v1894_v22, %s1765_s26 }
  0xad   :  { %v198_v36 = vpop.permute.xlu1 %197  ;;  %v68_v37 = vpop.permute.xlu0 %67 }
  0xae   :  { %v203_v39 = vsel %vm76_vm4, %v202_v34, %v198_v36  ;;  %v77_v40 = vsel %vm76_vm4, %v75_v35, %v68_v37 }
  0xaf   :  { %v204_v41 = vmul.f32 %v203_v39, %v1995_v33  ;;  %v78_v42 = vmul.f32 %v77_v40, %v1995_v33  ;;  %1372 = vrot.lane.b32.xlu1 %v1894_v22, %s1752_s15  ;;  %1292 = vrot.lane.b32.xlu0 %v1894_v22, %s1764_s25 }
  0xb1   :  { %v205_v43 = vadd.f32 %v204_v41, %v2002_v38  ;;  %v79_v44 = vadd.f32 %v78_v42, %v2002_v38  ;;  %v281_v45 = vpop.permute.xlu1 %280  ;;  %v278_v46 = vpop.permute.xlu0 %277 }
  0xb2   :  { %v289_v49 = vsel %vm70_vm1, %v278_v46, %v281_v45 }
  0xb3   :  { %1644 = vtanh.f32 %v205_v43  ;;  %1464 = vrot.lane.b32.xlu1 %v1894_v22, %s1751_s12  ;;  %1375 = vrot.lane.b32.xlu0 %v1894_v22, %s1754_s16  ;;  %v290_v54 = vsel %vm72_vm2, %v289_v49, %v1852_v10 }
  0xb4   :  { %1646 = vtanh.f32 %v79_v44 }
  0xb5   :  { %v370_v47 = vpop.permute.xlu1 %369  ;;  %v367_v48 = vpop.permute.xlu0 %366 }
  0xb6   :  { %v378_v50 = vsel %vm70_vm1, %v367_v48, %v370_v47 }
  0xb7   :  { %1378 = vrot.lane.b32.xlu1 %v1894_v22, %s1755_s17  ;;  %1467 = vrot.lane.b32.xlu0 %v1894_v22, %s1752_s15 }
  0xb9   :  { %v284_v51 = vpop.permute.xlu1 %283  ;;  %v373_v52 = vpop.permute.xlu0 %372 }
  0xba   :  { %v379_v53 = vsel %vm72_vm2, %v378_v50, %v373_v52  ;;  %v291_v56 = vsel %vm74_vm3, %v290_v54, %v284_v51 }
  0xbb   :  { %1381 = vrot.lane.b32.xlu1 %v1894_v22, %s1766_s27  ;;  %1470 = vrot.lane.b32.xlu0 %v1894_v22, %s1754_s16  ;;  %v380_v58 = vsel %vm74_vm3, %v379_v53, %v1865_v16 }
  0xbd   :  { %v1645_v55 = vpop.eup %1644  ;;  %v376_v57 = vpop.permute.xlu1 %375 }
  0xbe   :  { %v287_v59 = vpop.permute.xlu0 %286  ;;  %v1647_v60 = vpop.eup %1646  ;;  %v381_v61 = vsel %vm76_vm4, %v380_v58, %v376_v57  ;;  %v207_v63 = vpack.c.bf16 %v1645_v55, %v1645_v55 }
  0xbf   :  { %v292_v62 = vsel %vm76_vm4, %v291_v56, %v287_v59  ;;  %v382_v2 = vmul.f32 %v381_v61, %v1995_v33  ;;  %1384 = vrot.lane.b32.xlu1 %v1894_v22, %s1765_s26  ;;  %1473 = vrot.lane.b32.xlu0 %v1894_v22, %s1755_s17  ;;  %v81_v4 = vpack.c.bf16 %v1647_v60, %v1647_v60 }
  0xc0   :  { %v293_v3 = vmul.f32 %v292_v62, %v1995_v33  ;;  %1575 = vmatmul.mubr.msk.bf16.vlgmr.msra.gmra.mrb[0].mxu1 %vm107_vm5, %v207_v63 }
  0xc1   :  { %v383_v5 = vadd.f32 %v382_v2, %v2002_v38  ;;  %1573 = vmatmul.mubr.msk.bf16.vlgmr.msra.gmra.mrb[0].mxu0 %vm107_vm5, %v81_v4  ;;  %v459_v10 = vpop.permute.xlu1 %458  ;;  %390 = vmatpush1.bf16.msra.mxu1 %v1842_v8 }
  0xc2   :  { %v294_v6 = vadd.f32 %v293_v3, %v2002_v38  ;;  %v456_v12 = vpop.permute.xlu0 %455  ;;  %301 = vmatpush1.bf16.msra.mxu0 %v1842_v8  ;;  %391 = vmatprep.subr.bf16.mxu1 %v1850_v9 }
  0xc3   :  { %1648 = vtanh.f32 %v383_v5  ;;  %1476 = vrot.lane.b32.xlu0 %v1894_v22, %s1766_s27  ;;  %302 = vmatprep.subr.bf16.mxu0 %v1850_v9  ;;  %v467_v21 = vsel %vm70_vm1, %v456_v12, %v459_v10 }
  0xc4   :  { %1650 = vtanh.f32 %v294_v6  ;;  %332 = vmatprep.mubr.bf16.mxu0 %v1757_v19  ;;  %421 = vmatprep.mubr.bf16.mxu1 %v1757_v19 }
  0xc5   :  { %v548_v13 = vpop.permute.xlu1 %547  ;;  %392 = vmatpush1.bf16.msra.mxu1 %v1854_v11 }
  0xc6   :  { %v545_v15 = vpop.permute.xlu0 %544  ;;  %303 = vmatpush1.bf16.msra.mxu0 %v1854_v11  ;;  %1578 = vmatprep.subr.msk.bf16.mxu1 %vm111_vm0, %v1863_v14 }
  0xc7   :  { %1576 = vmatprep.subr.msk.bf16.mxu0 %vm111_vm0, %v1863_v14  ;;  %v559_v30 = vsel %vm70_vm1, %v545_v15, %v548_v13 }
  0xc9   :  { %v551_v16 = vpop.permute.xlu1 %550  ;;  %394 = vmatpush1.bf16.msra.mxu1 %v1872_v17 }
  0xca   :  { %v462_v18 = vpop.permute.xlu0 %461  ;;  %305 = vmatpush1.bf16.msra.mxu0 %v1872_v17  ;;  %570 = vmatprep.subr.bf16.mxu1 %v1840_v7  ;;  %v560_v32 = vsel %vm72_vm2, %v559_v30, %v551_v16 }
  0xcb   :  { %478 = vmatprep.subr.bf16.mxu0 %v1840_v7  ;;  %v468_v23 = vsel %vm72_vm2, %v467_v21, %v462_v18 }
  0xcd   :  { %v1649_v22 = vpop.eup %1648  ;;  %v554_v24 = vpop.permute.xlu1 %553 }
  0xce   :  { %v465_v25 = vpop.permute.xlu0 %464  ;;  %v1651_v26 = vpop.eup %1650  ;;  %v385_v27 = vpack.c.bf16 %v1649_v22, %v1649_v22  ;;  %v561_v35 = vsel %vm74_vm3, %v560_v32, %v554_v24 }
  0xcf   :  { %v469_v28 = vsel %vm74_vm3, %v468_v23, %v465_v25  ;;  %v296_v29 = vpack.c.bf16 %v1651_v26, %v1651_v26 }
  0xd0   :  { %v470_v31 = vsel %vm76_vm4, %v469_v28, %v1887_v20  ;;  %1579 = vmatmul.mubr.msk.bf16.vlgmr.msra.gmra.mrb[4].mxu1 %vm107_vm5, %v385_v27 }
  0xd1   :  { %v471_v34 = vmul.f32 %v470_v31, %v1995_v33  ;;  %1577 = vmatmul.mubr.msk.bf16.vlgmr.msra.gmra.mrb[4].mxu0 %vm107_vm5, %v296_v29  ;;  %v637_v36 = vpop.permute.xlu1 %636  ;;  %571 = vmatpush1.bf16.msra.mxu1 %v1842_v8 }
  0xd2   :  { %v557_v37 = vpop.permute.xlu0 %556  ;;  %479 = vmatpush1.bf16.msra.mxu0 %v1842_v8  ;;  %572 = vmatprep.subr.bf16.mxu1 %v1850_v9 }
  0xd3   :  { %v472_v39 = vadd.f32 %v471_v34, %v2002_v38  ;;  %v562_v40 = vsel %vm76_vm4, %v561_v35, %v557_v37  ;;  %480 = vmatprep.subr.bf16.mxu0 %v1850_v9  ;;  %510 = vmatprep.mubr.bf16.mxu0 %v1757_v19 }
  0xd4   :  { %v563_v20 = vmul.f32 %v562_v40, %v1995_v33  ;;  %602 = vmatprep.mubr.bf16.mxu1 %v1757_v19 }
  0xd5   :  { %1652 = vtanh.f32 %v472_v39  ;;  %v729_v42 = vpop.permute.xlu1 %728  ;;  %573 = vmatpush1.bf16.msra.mxu1 %v1854_v11 }
  0xd6   :  { %v564_v41 = vadd.f32 %v563_v20, %v2002_v38  ;;  %v640_v43 = vpop.permute.xlu0 %639  ;;  %481 = vmatpush1.bf16.msra.mxu0 %v1854_v11  ;;  %1583 = vmatprep.subr.msk.bf16.mxu1 %vm111_vm0, %v1863_v14 }
  0xd7   :  { %1580 = vmatprep.subr.msk.bf16.mxu0 %vm111_vm0, %v1863_v14  ;;  %v651_v50 = vsel %vm70_vm1, %v637_v36, %v640_v43 }
  0xd8   :  { %1654 = vtanh.f32 %v564_v41 }
  0xd9   :  { %v643_v44 = vpop.permute.xlu1 %642  ;;  %575 = vmatpush1.bf16.msra.mxu1 %v1872_v17 }
  0xda   :  { %v732_v45 = vpop.permute.xlu0 %731  ;;  %483 = vmatpush1.bf16.msra.mxu0 %v1872_v17  ;;  %754 = vmatprep.subr.bf16.mxu1 %v1840_v7  ;;  %v652_v51 = vsel %vm72_vm2, %v651_v50, %v643_v44 }
  0xdb   :  { %662 = vmatprep.subr.bf16.mxu0 %v1840_v7  ;;  %v743_v58 = vsel %vm70_vm1, %v729_v42, %v732_v45 }
  0xdd   :  { %v646_v46 = vpop.permute.xlu1 %645 }
  0xde   :  { %v735_v47 = vpop.permute.xlu0 %734  ;;  %v653_v53 = vsel %vm74_vm3, %v652_v51, %v646_v46 }
  0xdf   :  { %v1653_v48 = vpop.eup %1652  ;;  %v744_v60 = vsel %vm72_vm2, %v743_v58, %v735_v47 }
  0xe0   :  { %v474_v49 = vpack.c.bf16 %v1653_v48, %v1653_v48 }
  0xe1   :  { %v649_v54 = vpop.permute.xlu1 %648 }
  0xe2   :  { %v1655_v52 = vpop.eup %1654  ;;  %v738_v55 = vpop.permute.xlu0 %737  ;;  %1581 = vmatmul.mubr.msk.bf16.vlgmr.msra.gmra.mrb[8].mxu0 %vm107_vm5, %v474_v49  ;;  %v654_v57 = vsel %vm76_vm4, %v653_v53, %v649_v54 }
  0xe3   :  { %v566_v56 = vpack.c.bf16 %v1655_v52, %v1655_v52  ;;  %663 = vmatpush1.bf16.msra.mxu0 %v1842_v8  ;;  %694 = vmatprep.mubr.bf16.mxu0 %v1757_v19  ;;  %v655_v59 = vmul.f32 %v654_v57, %v1995_v33  ;;  %v745_v62 = vsel %vm74_vm3, %v744_v60, %v738_v55 }
  0xe4   :  { %664 = vmatprep.subr.bf16.mxu0 %v1850_v9 }
  0xe5   :  { %1584 = vmatmul.mubr.msk.bf16.vlgmr.msra.gmra.mrb[8].mxu1 %vm107_vm5, %v566_v56  ;;  %v656_v61 = vadd.f32 %v655_v59, %v2002_v38  ;;  %v821_v63 = vpop.permute.xlu1 %820 }
  0xe6   :  { %v741_v2 = vpop.permute.xlu0 %740  ;;  %755 = vmatpush1.bf16.msra.mxu1 %v1842_v8  ;;  %786 = vmatprep.mubr.bf16.mxu1 %v1757_v19 }
  0xe7   :  { %v746_v3 = vsel %vm76_vm4, %v745_v62, %v741_v2  ;;  %665 = vmatpush1.bf16.msra.mxu0 %v1854_v11  ;;  %756 = vmatprep.subr.bf16.mxu1 %v1850_v9  ;;  %1656 = vtanh.f32 %v656_v61 }
  0xe8   :  { %v747_v4 = vmul.f32 %v746_v3, %v1995_v33  ;;  %1586 = vmatprep.subr.msk.bf16.mxu0 %vm111_vm0, %v1863_v14 }
  0xe9   :  { %v913_v6 = vpop.permute.xlu1 %912 }
  0xea   :  { %v748_v5 = vadd.f32 %v747_v4, %v2002_v38  ;;  %v824_v10 = vpop.permute.xlu0 %823  ;;  %757 = vmatpush1.bf16.msra.mxu1 %v1854_v11 }
  0xeb   :  { %667 = vmatpush1.bf16.msra.mxu0 %v1872_v17  ;;  %1589 = vmatprep.subr.msk.bf16.mxu1 %vm111_vm0, %v1863_v14  ;;  %v835_v22 = vsel %vm70_vm1, %v821_v63, %v824_v10 }
  0xec   :  { %1658 = vtanh.f32 %v748_v5  ;;  %846 = vmatprep.subr.bf16.mxu0 %v1840_v7 }
  0xed   :  { %v827_v12 = vpop.permute.xlu1 %826 }
  0xee   :  { %v916_v13 = vpop.permute.xlu0 %915  ;;  %759 = vmatpush1.bf16.msra.mxu1 %v1872_v17  ;;  %v836_v23 = vsel %vm72_vm2, %v835_v22, %v827_v12 }
  0xef   :  { %938 = vmatprep.subr.bf16.mxu1 %v1840_v7  ;;  %v927_v30 = vsel %vm70_vm1, %v913_v6, %v916_v13 }
  0xf1   :  { %v1657_v15 = vpop.eup %1656  ;;  %v830_v16 = vpop.permute.xlu1 %829 }
  0xf2   :  { %v919_v18 = vpop.permute.xlu0 %918  ;;  %v658_v21 = vpack.c.bf16 %v1657_v15, %v1657_v15  ;;  %v837_v25 = vsel %vm74_vm3, %v836_v23, %v830_v16 }
  0xf3   :  { %v928_v32 = vsel %vm72_vm2, %v927_v30, %v919_v18 }
  0xf4   :  { %1587 = vmatmul.mubr.msk.bf16.vlgmr.msra.gmra.mrb[12].mxu0 %vm107_vm5, %v658_v21 }
  0xf5   :  { %v833_v26 = vpop.permute.xlu1 %832  ;;  %847 = vmatpush1.bf16.msra.mxu0 %v1842_v8  ;;  %878 = vmatprep.mubr.bf16.mxu0 %v1757_v19 }
  0xf6   :  { %v1659_v24 = vpop.eup %1658  ;;  %v922_v27 = vpop.permute.xlu0 %921  ;;  %v838_v29 = vsel %vm76_vm4, %v837_v25, %v833_v26  ;;  %848 = vmatprep.subr.bf16.mxu0 %v1850_v9 }
  0xf7   :  { %v750_v28 = vpack.c.bf16 %v1659_v24, %v1659_v24  ;;  %v839_v31 = vmul.f32 %v838_v29, %v1995_v33  ;;  %v929_v35 = vsel %vm74_vm3, %v928_v32, %v922_v27 }
  0xf9   :  { %1590 = vmatmul.mubr.msk.bf16.vlgmr.msra.gmra.mrb[12].mxu1 %vm107_vm5, %v750_v28  ;;  %v840_v34 = vadd.f32 %v839_v31, %v2002_v38  ;;  %v1005_v36 = vpop.permute.xlu1 %1004  ;;  %849 = vmatpush1.bf16.msra.mxu0 %v1854_v11 }
  0xfa   :  { %v925_v37 = vpop.permute.xlu0 %924  ;;  %939 = vmatpush1.bf16.msra.mxu1 %v1842_v8  ;;  %1592 = vmatprep.subr.msk.bf16.mxu0 %vm111_vm0, %v1863_v14 }
  0xfb   :  { %v930_v39 = vsel %vm76_vm4, %v929_v35, %v925_v37  ;;  %940 = vmatprep.subr.bf16.mxu1 %v1850_v9  ;;  %1660 = vtanh.f32 %v840_v34  ;;  %970 = vmatprep.mubr.bf16.mxu1 %v1757_v19 }
  0xfc   :  { %v931_v40 = vmul.f32 %v930_v39, %v1995_v33 }
  0xfd   :  { %v1097_v41 = vpop.permute.xlu1 %1096  ;;  %851 = vmatpush1.bf16.msra.mxu0 %v1872_v17 }
  0xfe   :  { %v932_v20 = vadd.f32 %v931_v40, %v2002_v38  ;;  %v1008_v42 = vpop.permute.xlu0 %1007  ;;  %941 = vmatpush1.bf16.msra.mxu1 %v1854_v11  ;;  %1030 = vmatprep.subr.bf16.mxu0 %v1840_v7 }
  0xff   :  { %1595 = vmatprep.subr.msk.bf16.mxu1 %vm111_vm0, %v1863_v14  ;;  %v1019_v49 = vsel %vm70_vm1, %v1005_v36, %v1008_v42 }
 0x100   :  { %1662 = vtanh.f32 %v932_v20 }
 0x101   :  { %v1011_v43 = vpop.permute.xlu1 %1010 }
 0x102   :  { %v1100_v44 = vpop.permute.xlu0 %1099  ;;  %943 = vmatpush1.bf16.msra.mxu1 %v1872_v17  ;;  %v1020_v50 = vsel %vm72_vm2, %v1019_v49, %v1011_v43 }
 0x103   :  { %1122 = vmatprep.subr.bf16.mxu1 %v1840_v7  ;;  %v1111_v57 = vsel %vm70_vm1, %v1097_v41, %v1100_v44 }
 0x105   :  { %v1661_v45 = vpop.eup %1660  ;;  %v1014_v46 = vpop.permute.xlu1 %1013 }
 0x106   :  { %v1103_v47 = vpop.permute.xlu0 %1102  ;;  %v842_v48 = vpack.c.bf16 %v1661_v45, %v1661_v45  ;;  %v1021_v52 = vsel %vm74_vm3, %v1020_v50, %v1014_v46 }
 0x107   :  { %v1112_v59 = vsel %vm72_vm2, %v1111_v57, %v1103_v47 }
 0x108   :  { %1593 = vmatmul.mubr.msk.bf16.vlgmr.msra.gmra.mrb[16].mxu0 %vm107_vm5, %v842_v48 }
 0x109   :  { %v1017_v53 = vpop.permute.xlu1 %1016  ;;  %1031 = vmatpush1.bf16.msra.mxu0 %v1842_v8  ;;  %1062 = vmatprep.mubr.bf16.mxu0 %v1757_v19 }
 0x10a   :  { %v1663_v51 = vpop.eup %1662  ;;  %v1106_v54 = vpop.permute.xlu0 %1105  ;;  %v1022_v56 = vsel %vm76_vm4, %v1021_v52, %v1017_v53  ;;  %1032 = vmatprep.subr.bf16.mxu0 %v1850_v9 }
 0x10b   :  { %v934_v55 = vpack.c.bf16 %v1663_v51, %v1663_v51  ;;  %v1023_v58 = vmul.f32 %v1022_v56, %v1995_v33  ;;  %v1113_v61 = vsel %vm74_vm3, %v1112_v59, %v1106_v54 }
 0x10d   :  { %1596 = vmatmul.mubr.msk.bf16.vlgmr.msra.gmra.mrb[16].mxu1 %vm107_vm5, %v934_v55  ;;  %v1024_v60 = vadd.f32 %v1023_v58, %v2002_v38  ;;  %v1189_v62 = vpop.permute.xlu1 %1188  ;;  %1033 = vmatpush1.bf16.msra.mxu0 %v1854_v11 }
 0x10e   :  { %v1109_v63 = vpop.permute.xlu0 %1108  ;;  %1123 = vmatpush1.bf16.msra.mxu1 %v1842_v8  ;;  %1598 = vmatprep.subr.msk.bf16.mxu0 %vm111_vm0, %v1863_v14 }
 0x10f   :  { %v1114_v2 = vsel %vm76_vm4, %v1113_v61, %v1109_v63  ;;  %1124 = vmatprep.subr.bf16.mxu1 %v1850_v9  ;;  %1664 = vtanh.f32 %v1024_v60  ;;  %1154 = vmatprep.mubr.bf16.mxu1 %v1757_v19 }
 0x110   :  { %v1115_v3 = vmul.f32 %v1114_v2, %v1995_v33 }
 0x111   :  { %v1281_v5 = vpop.permute.xlu1 %1280  ;;  %1035 = vmatpush1.bf16.msra.mxu0 %v1872_v17 }
 0x112   :  { %v1116_v4 = vadd.f32 %v1115_v3, %v2002_v38  ;;  %v1192_v6 = vpop.permute.xlu0 %1191  ;;  %1125 = vmatpush1.bf16.msra.mxu1 %v1854_v11  ;;  %1214 = vmatprep.subr.bf16.mxu0 %v1840_v7 }
 0x113   :  { %1601 = vmatprep.subr.msk.bf16.mxu1 %vm111_vm0, %v1863_v14  ;;  %v1203_v21 = vsel %vm70_vm1, %v1189_v62, %v1192_v6 }
 0x114   :  { %1666 = vtanh.f32 %v1116_v4 }
 0x115   :  { %v1195_v10 = vpop.permute.xlu1 %1194 }
 0x116   :  { %v1284_v12 = vpop.permute.xlu0 %1283  ;;  %1127 = vmatpush1.bf16.msra.mxu1 %v1872_v17  ;;  %v1204_v22 = vsel %vm72_vm2, %v1203_v21, %v1195_v10 }
 0x117   :  { %1306 = vmatprep.subr.bf16.mxu1 %v1840_v7  ;;  %v1295_v29 = vsel %vm70_vm1, %v1281_v5, %v1284_v12 }
 0x119   :  { %v1665_v13 = vpop.eup %1664  ;;  %v1198_v15 = vpop.permute.xlu1 %1197 }
 0x11a   :  { %v1287_v16 = vpop.permute.xlu0 %1286  ;;  %v1026_v18 = vpack.c.bf16 %v1665_v13, %v1665_v13  ;;  %v1205_v24 = vsel %vm74_vm3, %v1204_v22, %v1198_v15 }
 0x11b   :  { %v1296_v31 = vsel %vm72_vm2, %v1295_v29, %v1287_v16 }
 0x11c   :  { %1599 = vmatmul.mubr.msk.bf16.vlgmr.msra.gmra.mrb[20].mxu0 %vm107_vm5, %v1026_v18 }
 0x11d   :  { %v1201_v25 = vpop.permute.xlu1 %1200  ;;  %1215 = vmatpush1.bf16.msra.mxu0 %v1842_v8  ;;  %1246 = vmatprep.mubr.bf16.mxu0 %v1757_v19 }
 0x11e   :  { %v1667_v23 = vpop.eup %1666  ;;  %v1290_v26 = vpop.permute.xlu0 %1289  ;;  %v1206_v28 = vsel %vm76_vm4, %v1205_v24, %v1201_v25  ;;  %1216 = vmatprep.subr.bf16.mxu0 %v1850_v9 }
 0x11f   :  { %v1118_v27 = vpack.c.bf16 %v1667_v23, %v1667_v23  ;;  %v1207_v30 = vmul.f32 %v1206_v28, %v1995_v33  ;;  %v1297_v34 = vsel %vm74_vm3, %v1296_v31, %v1290_v26 }
 0x121   :  { %1602 = vmatmul.mubr.msk.bf16.vlgmr.msra.gmra.mrb[20].mxu1 %vm107_vm5, %v1118_v27  ;;  %v1208_v32 = vadd.f32 %v1207_v30, %v2002_v38  ;;  %v1373_v35 = vpop.permute.xlu1 %1372  ;;  %1217 = vmatpush1.bf16.msra.mxu0 %v1854_v11 }
 0x122   :  { %v1293_v36 = vpop.permute.xlu0 %1292  ;;  %1307 = vmatpush1.bf16.msra.mxu1 %v1842_v8  ;;  %1604 = vmatprep.subr.msk.bf16.mxu0 %vm111_vm0, %v1863_v14 }
 0x123   :  { %v1298_v37 = vsel %vm76_vm4, %v1297_v34, %v1293_v36  ;;  %1308 = vmatprep.subr.bf16.mxu1 %v1850_v9  ;;  %1668 = vtanh.f32 %v1208_v32  ;;  %1338 = vmatprep.mubr.bf16.mxu1 %v1757_v19 }
 0x124   :  { %v1299_v39 = vmul.f32 %v1298_v37, %v1995_v33 }
 0x125   :  { %v1465_v20 = vpop.permute.xlu1 %1464  ;;  %1219 = vmatpush1.bf16.msra.mxu0 %v1872_v17 }
 0x126   :  { %v1300_v40 = vadd.f32 %v1299_v39, %v2002_v38  ;;  %v1376_v41 = vpop.permute.xlu0 %1375  ;;  %1309 = vmatpush1.bf16.msra.mxu1 %v1854_v11  ;;  %1398 = vmatprep.subr.bf16.mxu0 %v1840_v7 }
 0x127   :  { %1607 = vmatprep.subr.msk.bf16.mxu1 %vm111_vm0, %v1863_v14  ;;  %v1387_v48 = vsel %vm70_vm1, %v1373_v35, %v1376_v41 }
 0x128   :  { %1670 = vtanh.f32 %v1300_v40 }
 0x129   :  { %v1379_v42 = vpop.permute.xlu1 %1378 }
 0x12a   :  { %v1468_v43 = vpop.permute.xlu0 %1467  ;;  %1311 = vmatpush1.bf16.msra.mxu1 %v1872_v17  ;;  %v1388_v49 = vsel %vm72_vm2, %v1387_v48, %v1379_v42 }
 0x12b   :  { %1490 = vmatprep.subr.bf16.mxu1 %v1840_v7  ;;  %v1479_v55 = vsel %vm70_vm1, %v1465_v20, %v1468_v43 }
 0x12d   :  { %v1669_v44 = vpop.eup %1668  ;;  %v1382_v45 = vpop.permute.xlu1 %1381 }
 0x12e   :  { %v1471_v46 = vpop.permute.xlu0 %1470  ;;  %v1210_v47 = vpack.c.bf16 %v1669_v44, %v1669_v44  ;;  %v1389_v51 = vsel %vm74_vm3, %v1388_v49, %v1382_v45 }
 0x12f   :  { %v1480_v57 = vsel %vm72_vm2, %v1479_v55, %v1471_v46 }
 0x130   :  { %1605 = vmatmul.mubr.msk.bf16.vlgmr.msra.gmra.mrb[24].mxu0 %vm107_vm5, %v1210_v47 }
 0x131   :  { %v1385_v52 = vpop.permute.xlu1 %1384  ;;  %1399 = vmatpush1.bf16.msra.mxu0 %v1842_v8  ;;  %1430 = vmatprep.mubr.bf16.mxu0 %v1757_v19 }
 0x132   :  { %v1671_v50 = vpop.eup %1670  ;;  %v1474_v53 = vpop.permute.xlu0 %1473  ;;  %v1390_v54 = vsel %vm76_vm4, %v1389_v51, %v1385_v52  ;;  %1400 = vmatprep.subr.bf16.mxu0 %v1850_v9 }
 0x133   :  { %v1302_v7 = vpack.c.bf16 %v1671_v50, %v1671_v50  ;;  %v1391_v56 = vmul.f32 %v1390_v54, %v1995_v33  ;;  %v1481_v59 = vsel %vm74_vm3, %v1480_v57, %v1474_v53 }
 0x135   :  { %1608 = vmatmul.mubr.msk.bf16.vlgmr.msra.gmra.mrb[24].mxu1 %vm107_vm5, %v1302_v7  ;;  %v1392_v58 = vadd.f32 %v1391_v56, %v2002_v38  ;;  %1401 = vmatpush1.bf16.msra.mxu0 %v1854_v11 }
 0x136   :  { %v1477_v60 = vpop.permute.xlu0 %1476  ;;  %1491 = vmatpush1.bf16.msra.mxu1 %v1842_v8  ;;  %1610 = vmatprep.subr.msk.bf16.mxu0 %vm111_vm0, %v1863_v14 }
 0x137   :  { %v1482_v61 = vsel %vm76_vm4, %v1481_v59, %v1477_v60  ;;  %1492 = vmatprep.subr.bf16.mxu1 %v1850_v9  ;;  %1672 = vtanh.f32 %v1392_v58  ;;  %1522 = vmatprep.mubr.bf16.mxu1 %v1757_v19  ;;  %v1767_v19 = vmov 1966171168  }
 0x138   :  { %v1483_v62 = vmul.f32 %v1482_v61, %v1995_v33 }
 0x139   :  { %1403 = vmatpush1.bf16.msra.mxu0 %v1872_v17 }
 0x13a   :  { %v1484_v63 = vadd.f32 %v1483_v62, %v2002_v38  ;;  %1493 = vmatpush1.bf16.msra.mxu1 %v1854_v11  ;;  %v163_v38 = vunpack.c.l.s4 %v1767_v19 }
 0x13b   :  { %1613 = vmatprep.subr.msk.bf16.mxu1 %vm111_vm0, %v1863_v14 }
 0x13c   :  { %1674 = vtanh.f32 %v1484_v63  ;;  %v164_v3 = vunpack.c.0.s8 %v163_v38 }
 0x13e   :  { %1495 = vmatpush1.bf16.msra.mxu1 %v1872_v17  ;;  %v2246_v4 = vsub.s32 %v164_v3, %v1827_v1 }
 0x141   :  { %v1673_v8 = vpop.eup %1672 }
 0x142   :  { %v1394_v2 = vpack.c.bf16 %v1673_v8, %v1673_v8 }
 0x144   :  { %1611 = vmatmul.mubr.msk.bf16.vlgmr.msra.gmra.mrb[28].mxu0 %vm107_vm5, %v1394_v2 }
 0x146   :  { %v1675_v9 = vpop.eup %1674 }
 0x147   :  { %v1486_v33 = vpack.c.bf16 %v1675_v9, %v1675_v9 }
 0x149   :  { %1614 = vmatmul.mubr.msk.bf16.vlgmr.msra.gmra.mrb[28].mxu1 %vm107_vm5, %v1486_v33 }
 0x193   :  { %v245_v11 = vpop.f32.mrb[0].mxu1 }
 0x194   :  { %v152_v5 = vpop.f32.mrb[0].mxu0  ;;  %v247_v14 = vpop.f32.mrb[1].mxu1 }
 0x195   :  { %v154_v6 = vpop.f32.mrb[1].mxu0  ;;  %v254_v10 = vcombine.low %v245_v11, %v247_v14  ;;  %v249_v17 = vpop.f32.mrb[2].mxu1 }
 0x196   :  { %v161_v12 = vcombine.low %v152_v5, %v154_v6  ;;  %v156_v13 = vpop.f32.mrb[2].mxu0  ;;  %v250_v15 = vpop.f32.mrb[3].mxu1 }
 0x197   :  { %v261_v16 = vrot.slane %v254_v10, %v2246_v4  ;;  %v157_v18 = vpop.f32.mrb[3].mxu0 }
 0x198   :  { %v168_v1 = vrot.slane %v161_v12, %v2246_v4 }
 0x199   :  { %v268_v22 = vrot.slane %v261_v16, %v2246_v4 }
 0x19a   :  { %v175_v23 = vrot.slane %v168_v1, %v2246_v4 }
 0x19b   :  { %270 = vst.msk [vmem:[#allocation7 + $0x2] sm:$0x3] %vm2250_vm6, %v268_v22 }
 0x19c   :  { %181 = vst.msk [vmem:[#allocation7] sm:$0x3] %vm2250_vm6, %v175_v23 }
 0x1a3   :  { %v423_v24 = vpop.f32.mrb[4].mxu1 }
 0x1a4   :  { %v334_v25 = vpop.f32.mrb[4].mxu0  ;;  %v425_v26 = vpop.f32.mrb[5].mxu1 }
 0x1a5   :  { %v336_v27 = vpop.f32.mrb[5].mxu0  ;;  %v432_v0 = vcombine.low %v423_v24, %v425_v26  ;;  %v427_v28 = vpop.f32.mrb[6].mxu1 }
 0x1a6   :  { %v343_v29 = vcombine.low %v334_v25, %v336_v27  ;;  %v338_v30 = vpop.f32.mrb[6].mxu0  ;;  %v428_v31 = vpop.f32.mrb[7].mxu1 }
 0x1a7   :  { %v439_v32 = vrot.slane %v432_v0, %v2246_v4  ;;  %v339_v34 = vpop.f32.mrb[7].mxu0 }
 0x1a8   :  { %v350_v35 = vrot.slane %v343_v29, %v2246_v4 }
 0x1a9   :  { %v446_v36 = vrot.slane %v439_v32, %v2246_v4 }
 0x1aa   :  { %v357_v37 = vrot.slane %v350_v35, %v2246_v4 }
 0x1ab   :  { %448 = vst.msk [vmem:[#allocation7 + $0x6] sm:$0x3] %vm2250_vm6, %v446_v36 }
 0x1ac   :  { %359 = vst.msk [vmem:[#allocation7 + $0x4] sm:$0x3] %vm2250_vm6, %v357_v37 }
 0x1b5   :  { %v512_v39 = vpop.f32.mrb[8].mxu0 }
 0x1b6   :  { %v514_v40 = vpop.f32.mrb[9].mxu0 }
 0x1b7   :  { %v521_v20 = vcombine.low %v512_v39, %v514_v40  ;;  %v516_v41 = vpop.f32.mrb[10].mxu0 }
 0x1b8   :  { %v517_v42 = vpop.f32.mrb[11].mxu0  ;;  %v604_v43 = vpop.f32.mrb[8].mxu1 }
 0x1b9   :  { %v528_v44 = vrot.slane %v521_v20, %v2246_v4  ;;  %v606_v45 = vpop.f32.mrb[9].mxu1 }
 0x1ba   :  { %v613_v46 = vcombine.low %v604_v43, %v606_v45  ;;  %v608_v47 = vpop.f32.mrb[10].mxu1 }
 0x1bb   :  { %v535_v48 = vrot.slane %v528_v44, %v2246_v4  ;;  %v609_v49 = vpop.f32.mrb[11].mxu1 }
 0x1bc   :  { %v620_v50 = vrot.slane %v613_v46, %v2246_v4 }
 0x1bd   :  { %537 = vst.msk [vmem:[#allocation7 + $0x8] sm:$0x3] %vm2250_vm6, %v535_v48 }
 0x1be   :  { %v627_v51 = vrot.slane %v620_v50, %v2246_v4 }
 0x1c0   :  { %629 = vst.msk [vmem:[#allocation7 + $0xa] sm:$0x3] %vm2250_vm6, %v627_v51 }
 0x1c7   :  { %v696_v52 = vpop.f32.mrb[12].mxu0 }
 0x1c8   :  { %v698_v53 = vpop.f32.mrb[13].mxu0 }
 0x1c9   :  { %v705_v7 = vcombine.low %v696_v52, %v698_v53  ;;  %v700_v54 = vpop.f32.mrb[14].mxu0 }
 0x1ca   :  { %v701_v55 = vpop.f32.mrb[15].mxu0 }
 0x1cb   :  { %v712_v56 = vrot.slane %v705_v7, %v2246_v4 }
 0x1cc   :  { %v788_v57 = vpop.f32.mrb[12].mxu1 }
 0x1cd   :  { %v790_v58 = vpop.f32.mrb[13].mxu1  ;;  %v719_v59 = vrot.slane %v712_v56, %v2246_v4 }
 0x1ce   :  { %v797_v60 = vcombine.low %v788_v57, %v790_v58  ;;  %v792_v61 = vpop.f32.mrb[14].mxu1 }
 0x1cf   :  { %v793_v62 = vpop.f32.mrb[15].mxu1  ;;  %721 = vst.msk [vmem:[#allocation7 + $0xc] sm:$0x3] %vm2250_vm6, %v719_v59 }
 0x1d0   :  { %v804_v63 = vrot.slane %v797_v60, %v2246_v4 }
 0x1d2   :  { %v811_v8 = vrot.slane %v804_v63, %v2246_v4 }
 0x1d4   :  { %813 = vst.msk [vmem:[#allocation7 + $0xe] sm:$0x3] %vm2250_vm6, %v811_v8 }
 0x1db   :  { %v880_v2 = vpop.f32.mrb[16].mxu0 }
 0x1dc   :  { %v882_v9 = vpop.f32.mrb[17].mxu0 }
 0x1dd   :  { %v889_v33 = vcombine.low %v880_v2, %v882_v9  ;;  %v884_v19 = vpop.f32.mrb[18].mxu0 }
 0x1de   :  { %v885_v38 = vpop.f32.mrb[19].mxu0 }
 0x1df   :  { %v896_v3 = vrot.slane %v889_v33, %v2246_v4 }
 0x1e0   :  { %v972_v11 = vpop.f32.mrb[16].mxu1 }
 0x1e1   :  { %v974_v5 = vpop.f32.mrb[17].mxu1  ;;  %v903_v14 = vrot.slane %v896_v3, %v2246_v4 }
 0x1e2   :  { %v981_v6 = vcombine.low %v972_v11, %v974_v5  ;;  %v976_v10 = vpop.f32.mrb[18].mxu1 }
 0x1e3   :  { %v977_v17 = vpop.f32.mrb[19].mxu1  ;;  %905 = vst.msk [vmem:[#allocation7 + $0x10] sm:$0x3] %vm2250_vm6, %v903_v14 }
 0x1e4   :  { %v988_v12 = vrot.slane %v981_v6, %v2246_v4 }
 0x1e6   :  { %v995_v13 = vrot.slane %v988_v12, %v2246_v4 }
 0x1e8   :  { %997 = vst.msk [vmem:[#allocation7 + $0x12] sm:$0x3] %vm2250_vm6, %v995_v13 }
 0x1ef   :  { %v1064_v15 = vpop.f32.mrb[20].mxu0 }
 0x1f0   :  { %v1066_v16 = vpop.f32.mrb[21].mxu0 }
 0x1f1   :  { %v1073_v18 = vcombine.low %v1064_v15, %v1066_v16  ;;  %v1068_v1 = vpop.f32.mrb[22].mxu0 }
 0x1f2   :  { %v1069_v22 = vpop.f32.mrb[23].mxu0 }
 0x1f3   :  { %v1080_v23 = vrot.slane %v1073_v18, %v2246_v4 }
 0x1f4   :  { %v1156_v24 = vpop.f32.mrb[20].mxu1 }
 0x1f5   :  { %v1158_v25 = vpop.f32.mrb[21].mxu1  ;;  %v1087_v26 = vrot.slane %v1080_v23, %v2246_v4 }
 0x1f6   :  { %v1165_v27 = vcombine.low %v1156_v24, %v1158_v25  ;;  %v1160_v0 = vpop.f32.mrb[22].mxu1 }
 0x1f7   :  { %v1161_v28 = vpop.f32.mrb[23].mxu1  ;;  %1089 = vst.msk [vmem:[#allocation7 + $0x14] sm:$0x3] %vm2250_vm6, %v1087_v26 }
 0x1f8   :  { %v1172_v29 = vrot.slane %v1165_v27, %v2246_v4 }
 0x1fa   :  { %v1179_v30 = vrot.slane %v1172_v29, %v2246_v4 }
 0x1fc   :  { %1181 = vst.msk [vmem:[#allocation7 + $0x16] sm:$0x3] %vm2250_vm6, %v1179_v30 }
 0x203   :  { %v1248_v31 = vpop.f32.mrb[24].mxu0 }
 0x204   :  { %v1250_v32 = vpop.f32.mrb[25].mxu0 }
 0x205   :  { %v1257_v34 = vcombine.low %v1248_v31, %v1250_v32  ;;  %v1252_v35 = vpop.f32.mrb[26].mxu0 }
 0x206   :  { %v1253_v36 = vpop.f32.mrb[27].mxu0 }
 0x207   :  { %v1264_v37 = vrot.slane %v1257_v34, %v2246_v4 }
 0x208   :  { %v1340_v39 = vpop.f32.mrb[24].mxu1 }
 0x209   :  { %v1342_v40 = vpop.f32.mrb[25].mxu1  ;;  %v1271_v20 = vrot.slane %v1264_v37, %v2246_v4 }
 0x20a   :  { %v1349_v41 = vcombine.low %v1340_v39, %v1342_v40  ;;  %v1344_v42 = vpop.f32.mrb[26].mxu1 }
 0x20b   :  { %v1345_v43 = vpop.f32.mrb[27].mxu1  ;;  %1273 = vst.msk [vmem:[#allocation7 + $0x18] sm:$0x3] %vm2250_vm6, %v1271_v20 }
 0x20c   :  { %v1356_v44 = vrot.slane %v1349_v41, %v2246_v4 }
 0x20e   :  { %v1363_v45 = vrot.slane %v1356_v44, %v2246_v4 }
 0x210   :  { %1365 = vst.msk [vmem:[#allocation7 + $0x1a] sm:$0x3] %vm2250_vm6, %v1363_v45 }
 0x217   :  { %v1432_v46 = vpop.f32.mrb[28].mxu0 }
 0x218   :  { %v1434_v47 = vpop.f32.mrb[29].mxu0 }
 0x219   :  { %v1441_v48 = vcombine.low %v1432_v46, %v1434_v47  ;;  %v1436_v49 = vpop.f32.mrb[30].mxu0 }
 0x21a   :  { %v1437_v50 = vpop.f32.mrb[31].mxu0 }
 0x21b   :  { %v1448_v51 = vrot.slane %v1441_v48, %v2246_v4 }
 0x21c   :  { %v1524_v52 = vpop.f32.mrb[28].mxu1 }
 0x21d   :  { %v1526_v53 = vpop.f32.mrb[29].mxu1  ;;  %v1455_v7 = vrot.slane %v1448_v51, %v2246_v4 }
 0x21e   :  { %v1533_v54 = vcombine.low %v1524_v52, %v1526_v53  ;;  %v1528_v55 = vpop.f32.mrb[30].mxu1 }
 0x21f   :  { %v1529_v56 = vpop.f32.mrb[31].mxu1  ;;  %1457 = vst.msk [vmem:[#allocation7 + $0x1c] sm:$0x3] %vm2250_vm6, %v1455_v7 }
 0x220   :  { %v1540_v57 = vrot.slane %v1533_v54, %v2246_v4 }
 0x222   :  { %v1547_v58 = vrot.slane %v1540_v57, %v2246_v4 }
 0x224   :  { %1549 = vst.msk [vmem:[#allocation7 + $0x1e] sm:$0x3] %vm2250_vm6, %v1547_v58 }
 0x225   :  { %1731 = shalt.err (!%p1728_p6)
}
 0x226   :  { %s1732_s9 = scalar_lea.hbm %s2333_s4, 512 }
 0x227   :  { %p1733_p7 = scmp.ne.s32.totalorder %s2333_s4, %s1732_s9  ;;  %p1736_p8 = scmp.lt.u32.totalorder %s1732_s9, %s2333_s4 }
 0x229   :  { %p1738_p9 = pnand %p1736_p8, %p1733_p7 }
 0x22b   :  { %1741 = shalt.err (!%p1738_p9)
}
 0x22c   :  { %1559 = dma.vmem_to_hbm [thread:$0]  %s1557_s2, 512, %s2333_s4, [#allocation4]  }
 0x22d   :  { %1746 = dma.done.wait [#allocation4], 512  }
 0x22e   :  { %1747 = vsyncadd [#allocation4], 4294966784 }
 0x22f   :  { %1563 = vsyncpa [#allocation3], 1 }
 0x230   :  { %1564 = vsyncpa [#allocation6], 1 }
 0x231   :  { %1565 = vsyncpa [#allocation4], 1 }

</bundles_post_ra>
